<compile_context>
chip_gen: v5e
topology: v5e:2x2
jax: 0.10.0
libtpu: 0.0.40
codegen_flags: <defaults>
</compile_context>

<pallas_src>
import functools

import jax
import jax.numpy as jnp
from jax import lax
from jax.experimental import pallas as pl
from jax.experimental.pallas import tpu as pltpu


def _round_up(x, m):
    return ((x + m - 1) // m) * m


def _supcon_kernel(a_ref, ct_ref, aid_ref, cid_ref, out_ref,
                   m_sc, l_sc, sp_sc, spl_sc, *,
                   inv_temp, num_valid_rows, num_valid_cols):
    """One (row-tile, col-tile) step of SupConLoss with online softmax.

    a_ref   : [tm, D]     bf16  anchor feature tile
    ct_ref  : [D,  tn]    bf16  pre-transposed contrast feature tile
    aid_ref : [tm, 1]     i32   anchor label ids
    cid_ref : [1,  tn]    i32   contrast label ids
    out_ref : [1, 1, 128] f32   lane-dense per-row-tile partial loss sum
    m_sc, l_sc, sp_sc, spl_sc : [tm, 1] f32 running accumulators
    """
    i = pl.program_id(0)
    k = pl.program_id(1)
    last_k = pl.num_programs(1) - 1

    @pl.when(k == 0)
    def _init():
        m_sc[...] = jnp.full_like(m_sc, -1e30)
        l_sc[...] = jnp.zeros_like(l_sc)
        sp_sc[...] = jnp.zeros_like(sp_sc)
        spl_sc[...] = jnp.zeros_like(spl_sc)

    # bf16 x bf16 -> f32 on the MXU; 1/temperature applied to the f32 logits.
    s = jnp.dot(a_ref[...], ct_ref[...],
                preferred_element_type=jnp.float32) * inv_temp        # [tm, tn]
    tm, tn = s.shape

    rows = i * tm + lax.broadcasted_iota(jnp.int32, (tm, 1), 0)       # [tm, 1]
    cols = k * tn + lax.broadcasted_iota(jnp.int32, (1, tn), 1)       # [1, tn]

    # Columns excluded from both positives and the softmax denominator:
    # the self-contrast diagonal and lane padding past the real N.
    excluded = jnp.logical_or(rows == cols, cols >= num_valid_cols)   # [tm, tn]
    s_valid = jnp.where(excluded, jnp.float32(-1e30), s)

    # --- online log-sum-exp over non-excluded columns ---
    m_prev = m_sc[...]
    m_new = jnp.maximum(m_prev, jnp.max(s_valid, axis=1, keepdims=True))
    alpha = jnp.exp(m_prev - m_new)
    l_sc[...] = alpha * l_sc[...] + jnp.sum(jnp.exp(s_valid - m_new),
                                            axis=1, keepdims=True)
    m_sc[...] = m_new

    # --- positive-pair accumulators on raw logits ---
    # (the row-max shift cancels in mean_pos(logits) - lse, so no rescale).
    pos = jnp.logical_and(aid_ref[...] == cid_ref[...],
                          jnp.logical_not(excluded))                  # [tm, tn] bool
    sp_sc[...] += jnp.sum(pos.astype(jnp.float32), axis=1, keepdims=True)
    spl_sc[...] += jnp.sum(jnp.where(pos, s, 0.0), axis=1, keepdims=True)

    @pl.when(k == last_k)
    def _finalize():
        lse = jnp.log(l_sc[...]) + m_sc[...]                          # [tm, 1]
        sp = sp_sc[...]
        # Rows with zero positives contribute 0 (PyTorch reference yields NaN
        # there from 0/0); documented deviation.
        mean_log_prob_pos = jnp.where(sp > 0.0, spl_sc[...] / sp - lse, 0.0)
        row_ids = i * tm + lax.broadcasted_iota(jnp.int32, (tm, 1), 0)
        valid = (row_ids < num_valid_rows).astype(jnp.float32)
        partial = jnp.sum(mean_log_prob_pos * valid)
        # Lane-dense store of the scalar partial; -(T/base_T)/M applied in JAX.
        out_ref[...] = jnp.full((1, 1, 128), partial, dtype=jnp.float32)


def supcon_loss(features, labels=None, mask=None, *, temperature=0.07,
                contrast_mode='all', base_temperature=0.07,
                block_m=256, block_n=512, feature_dtype=jnp.bfloat16):
    """Pallas implementation of SupConLoss.forward (forward pass only).

    Defaults (block_m=256, block_n=512) are safe on v5e/v6e/v7x; on v6e
    (128 MiB VMEM) block_m=512, block_n=1024+ amortize per-step overhead.
    """
    if features.ndim < 3:
        raise ValueError('`features` needs to be [bsz, n_views, ...]')
    if features.ndim > 3:
        features = features.reshape(features.shape[0], features.shape[1], -1)
    bsz, n_views, dim = features.shape

    if labels is not None and mask is not None:
        raise ValueError('Cannot define both `labels` and `mask`')

    if mask is not None:
        # TODO(synk): an arbitrary (possibly asymmetric) [bsz, bsz] mask cannot
        # be rebuilt in-kernel from label equality; this rare path stays in JAX.
        return _supcon_loss_ref(features, mask=mask, temperature=temperature,
                                contrast_mode=contrast_mode,
                                base_temperature=base_temperature)

    if labels is None:
        ids = jnp.arange(bsz, dtype=jnp.int32)            # SimCLR: eye mask
    else:
        labels = jnp.asarray(labels).reshape(-1)
        if labels.shape[0] != bsz:
            raise ValueError('Num of labels does not match num of features')
        ids = labels.astype(jnp.int32)

    contrast_count = n_views
    # torch.cat(torch.unbind(features, dim=1), dim=0): view-major ordering.
    contrast_feature = jnp.transpose(features, (1, 0, 2)).reshape(
        contrast_count * bsz, dim).astype(feature_dtype)

    if contrast_mode == 'one':
        anchor_count = 1
    elif contrast_mode == 'all':
        anchor_count = contrast_count
    else:
        raise ValueError('Unknown mode: {}'.format(contrast_mode))

    M = anchor_count * bsz
    N = contrast_count * bsz

    # Tile sizes: rows in multiples of 8 sublanes, cols in multiples of 128 lanes.
    tm = min(int(block_m), _round_up(M, 8))
    tn = min(int(block_n), _round_up(N, 128))
    m_pad = _round_up(M, tm)
    n_pad = _round_up(N, tn)
    grid = (m_pad // tm, n_pad // tn)

    # Anchor (LHS) buffer: in 'all' mode reuse the same bf16 contrast features
    # (no separate f32 anchor copy); in 'one' mode use view-0 features.
    if contrast_mode == 'all':
        anchor_buf = jnp.pad(contrast_feature, ((0, m_pad - M), (0, 0)))
    else:
        anchor_buf = jnp.pad(features[:, 0].astype(feature_dtype),
                             ((0, m_pad - M), (0, 0)))
    # One-time wrapper-side transpose so the kernel runs a standard (m,k)x(k,n)
    # MXU contraction with no per-step RHS relayout.
    contrast_t = jnp.pad(contrast_feature, ((0, n_pad - N), (0, 0))).T  # [D, n_pad]

    anchor_ids = jnp.pad(jnp.tile(ids, anchor_count), (0, m_pad - M),
                         constant_values=-1).reshape(m_pad, 1)
    contrast_ids = jnp.pad(jnp.tile(ids, contrast_count), (0, n_pad - N),
                           constant_values=-2).reshape(1, n_pad)

    kernel = functools.partial(
        _supcon_kernel,
        inv_temp=float(1.0 / temperature),
        num_valid_rows=M,
        num_valid_cols=N,
    )

    # Explicit VMEM budget: double-buffered bf16 tiles + [tm,tn] f32 temporaries
    # with headroom; >= default scoped limit, capped at 48 MiB (fits v7x 64 MiB/TC).
    est = (2 * (tm * dim + dim * tn) * 2          # bf16 anchor/contrast tile buffers
           + 12 * tm * tn * 4                     # [tm, tn] f32/bool temporaries
           + 8 * tm * 128 * 4 + 4 * tn * 4)       # scratch / ids / output (lane-padded)
    vmem_limit = int(min(48 * 2 ** 20, max(32 * 2 ** 20, 2 * est)))

    partials = pl.pallas_call(
        kernel,
        out_shape=jax.ShapeDtypeStruct((grid[0], 1, 128), jnp.float32),
        grid_spec=pltpu.PrefetchScalarGridSpec(
            num_scalar_prefetch=0,
            grid=grid,
            in_specs=[
                pl.BlockSpec((tm, dim), lambda i, k: (i, 0)),   # anchor tile
                pl.BlockSpec((dim, tn), lambda i, k: (0, k)),   # contrast^T tile
                pl.BlockSpec((tm, 1), lambda i, k: (i, 0)),     # anchor label ids
                pl.BlockSpec((1, tn), lambda i, k: (0, k)),     # contrast label ids
            ],
            out_specs=pl.BlockSpec((1, 1, 128), lambda i, k: (i, 0, 0)),
            scratch_shapes=[pltpu.VMEM((tm, 1), jnp.float32)] * 4,
        ),
        compiler_params=pltpu.CompilerParams(
            dimension_semantics=("parallel", "arbitrary"),
            vmem_limit_bytes=vmem_limit),
    )(anchor_buf, contrast_t, anchor_ids, contrast_ids)

    # loss.view(anchor_count, batch_size).mean() == (sum over all M anchors) / M.
    loss_scale = -(temperature / base_temperature)
    return loss_scale * jnp.sum(partials[:, 0, 0]) / M


def _supcon_loss_ref(features, labels=None, mask=None, *, temperature=0.07,
                     contrast_mode='all', base_temperature=0.07):
    """Plain-JAX (f32) mirror of the PyTorch forward, for correctness checking."""
    if features.ndim > 3:
        features = features.reshape(features.shape[0], features.shape[1], -1)
    bsz, n_views, dim = features.shape
    if labels is None and mask is None:
        mask = jnp.eye(bsz, dtype=jnp.float32)
    elif labels is not None:
        labels = jnp.asarray(labels).reshape(-1, 1)
        mask = (labels == labels.T).astype(jnp.float32)
    else:
        mask = jnp.asarray(mask).astype(jnp.float32)
    contrast_count = n_views
    contrast_feature = jnp.transpose(features, (1, 0, 2)).reshape(
        contrast_count * bsz, dim)
    if contrast_mode == 'one':
        anchor_feature = features[:, 0]
        anchor_count = 1
    else:
        anchor_feature = contrast_feature
        anchor_count = contrast_count
    logits = anchor_feature @ contrast_feature.T / temperature
    logits = logits - jnp.max(logits, axis=1, keepdims=True)
    mask = jnp.tile(mask, (anchor_count, contrast_count))
    M = anchor_count * bsz
    N = contrast_count * bsz
    logits_mask = 1.0 - jnp.eye(M, N, dtype=jnp.float32)
    mask = mask * logits_mask
    exp_logits = jnp.exp(logits) * logits_mask
    log_prob = logits - jnp.log(jnp.sum(exp_logits, axis=1, keepdims=True))
    mean_log_prob_pos = jnp.sum(mask * log_prob, axis=1) / jnp.sum(mask, axis=1)
    loss = -(temperature / base_temperature) * mean_log_prob_pos
    return jnp.mean(loss.reshape(anchor_count, bsz))


if __name__ == "__main__":
    key = jax.random.PRNGKey(0)
    k1, k2, k3, k4 = jax.random.split(key, 4)

    # Small case: single tile on both grid axes.
    bsz, n_views, dim = 8, 2, 32
    feats = jax.random.normal(k1, (bsz, n_views, dim), dtype=jnp.float32)
    feats = feats / jnp.linalg.norm(feats, axis=-1, keepdims=True)
    labels = jax.random.randint(k2, (bsz,), 0, 3)

    loss_unsup = supcon_loss(feats)                                  # SimCLR path
    jax.block_until_ready(loss_unsup)
    ref_unsup = _supcon_loss_ref(feats)

    loss_sup = supcon_loss(feats, labels=labels)                     # supervised
    jax.block_until_ready(loss_sup)
    ref_sup = _supcon_loss_ref(feats, labels=labels)

    loss_one = supcon_loss(feats, labels=labels, contrast_mode='one')
    jax.block_until_ready(loss_one)
    ref_one = _supcon_loss_ref(feats, labels=labels, contrast_mode='one')

    # Larger (still small) case exercising multiple row tiles, multiple
    # N-tiles (online-softmax accumulation) and the padded last column tile:
    # M = N = 144 -> tm=64 (grid_m=3), tn=128 (n_pad=256, grid_n=2).
    bsz2, n_views2, dim2 = 72, 2, 32
    feats2 = jax.random.normal(k3, (bsz2, n_views2, dim2), dtype=jnp.float32)
    feats2 = feats2 / jnp.linalg.norm(feats2, axis=-1, keepdims=True)
    labels2 = jax.random.randint(k4, (bsz2,), 0, 10)
    loss_big = supcon_loss(feats2, labels=labels2, block_m=64, block_n=128)
    jax.block_until_ready(loss_big)
    ref_big = _supcon_loss_ref(feats2, labels=labels2)

    # bf16 features in the kernel vs f32 reference -> modest tolerance.
    def check(a, b, name):
        assert jnp.allclose(a, b, rtol=3e-2, atol=3e-2), (name, a, b)

    check(loss_unsup, ref_unsup, "unsup")
    check(loss_sup, ref_sup, "sup")
    check(loss_one, ref_one, "one")
    check(loss_big, ref_big, "big")

    print("KERNEL_OK")
</pallas_src>

<mosaic_0001>
module attributes {stable_mosaic.version = 11 : i64} {
  func.func @_supcon_kernel(%arg0: i32, %arg1: i32, %arg2: memref<16x32xbf16, #tpu.memory_space<vmem>>, %arg3: memref<32x128xbf16, #tpu.memory_space<vmem>>, %arg4: memref<16x1xi32, #tpu.memory_space<vmem>>, %arg5: memref<1x128xi32, #tpu.memory_space<vmem>>, %arg6: memref<1x1x128xf32, #tpu.memory_space<vmem>>, %arg7: memref<16x1xf32, #tpu.memory_space<vmem>>, %arg8: memref<16x1xf32, #tpu.memory_space<vmem>>, %arg9: memref<16x1xf32, #tpu.memory_space<vmem>>, %arg10: memref<16x1xf32, #tpu.memory_space<vmem>>) attributes {dimension_semantics = [#tpu.dimension_semantics<parallel>, #tpu.dimension_semantics<arbitrary>], iteration_bounds = array<i64: 1, 1>, scalar_prefetch = 0 : i64, scratch_operands = 4 : i64, tpu.core_type = #tpu.core_type<tc>, window_params = [{transform_indices = @transform_0, window_bounds = array<i64: 16, 32>}, {transform_indices = @transform_1, window_bounds = array<i64: 32, 128>}, {transform_indices = @transform_2, window_bounds = array<i64: 16, 1>}, {transform_indices = @transform_3, window_bounds = array<i64: 1, 128>}, {transform_indices = @transform_4, window_bounds = array<i64: 1, 1, 128>}]} {
    %c0_i32 = arith.constant 0 : i32
    %0 = arith.cmpi eq, %arg1, %c0_i32 : i32
    %1 = arith.extui %0 : i1 to i32
    %c0_i32_0 = arith.constant 0 : i32
    %2 = arith.cmpi ne, %1, %c0_i32_0 : i32
    scf.if %2 {
      %cst_35 = arith.constant -1.000000e+30 : f32
      %65 = vector.broadcast %cst_35 : f32 to vector<16x1xf32>
      %c0_36 = arith.constant 0 : index
      %c0_37 = arith.constant 0 : index
      %66 = vector.load %arg7[%c0_36, %c0_37] : memref<16x1xf32, #tpu.memory_space<vmem>>, vector<16x1xf32>
      tpu.vector_store %arg7[%c0_36, %c0_37], %65 {strides = array<i32>} : memref<16x1xf32, #tpu.memory_space<vmem>>, vector<16x1xf32>,
      %cst_38 = arith.constant 0.000000e+00 : f32
      %67 = vector.broadcast %cst_38 : f32 to vector<16x1xf32>
      %c0_39 = arith.constant 0 : index
      %c0_40 = arith.constant 0 : index
      %68 = vector.load %arg8[%c0_39, %c0_40] : memref<16x1xf32, #tpu.memory_space<vmem>>, vector<16x1xf32>
      tpu.vector_store %arg8[%c0_39, %c0_40], %67 {strides = array<i32>} : memref<16x1xf32, #tpu.memory_space<vmem>>, vector<16x1xf32>,
      %cst_41 = arith.constant 0.000000e+00 : f32
      %69 = vector.broadcast %cst_41 : f32 to vector<16x1xf32>
      %c0_42 = arith.constant 0 : index
      %c0_43 = arith.constant 0 : index
      %70 = vector.load %arg9[%c0_42, %c0_43] : memref<16x1xf32, #tpu.memory_space<vmem>>, vector<16x1xf32>
      tpu.vector_store %arg9[%c0_42, %c0_43], %69 {strides = array<i32>} : memref<16x1xf32, #tpu.memory_space<vmem>>, vector<16x1xf32>,
      %cst_44 = arith.constant 0.000000e+00 : f32
      %71 = vector.broadcast %cst_44 : f32 to vector<16x1xf32>
      %c0_45 = arith.constant 0 : index
      %c0_46 = arith.constant 0 : index
      %72 = vector.load %arg10[%c0_45, %c0_46] : memref<16x1xf32, #tpu.memory_space<vmem>>, vector<16x1xf32>
      tpu.vector_store %arg10[%c0_45, %c0_46], %71 {strides = array<i32>} : memref<16x1xf32, #tpu.memory_space<vmem>>, vector<16x1xf32>,
    } else {
    }
    %c0 = arith.constant 0 : index
    %c0_1 = arith.constant 0 : index
    %3 = vector.load %arg2[%c0, %c0_1] : memref<16x32xbf16, #tpu.memory_space<vmem>>, vector<16x32xbf16>
    %c0_2 = arith.constant 0 : index
    %c0_3 = arith.constant 0 : index
    %4 = vector.load %arg3[%c0_2, %c0_3] : memref<32x128xbf16, #tpu.memory_space<vmem>>, vector<32x128xbf16>
    %cst = arith.constant dense<0.000000e+00> : vector<16x128xf32>
    %5 = tpu.matmul %3, %4, %cst {dimension_numbers = #tpu.dot_dimension_numbers<[1], [0], [0], [1], [0, 0, 1, 1], [], []>} : vector<16x32xbf16>, vector<32x128xbf16>, vector<16x128xf32> -> vector<16x128xf32>
    %cst_4 = arith.constant 14.2857141 : f32
    %6 = vector.broadcast %cst_4 : f32 to vector<16x128xf32>
    %7 = arith.mulf %5, %6 : vector<16x128xf32>
    %c16_i32 = arith.constant 16 : i32
    %8 = arith.muli %arg0, %c16_i32 : i32
    %9 = tpu.iota {dimensions = array<i32: 0>} : vector<16x1xi32>
    %10 = vector.broadcast %8 : i32 to vector<16x1xi32>
    %11 = arith.addi %10, %9 : vector<16x1xi32>
    %c128_i32 = arith.constant 128 : i32
    %12 = arith.muli %arg1, %c128_i32 : i32
    %13 = tpu.iota {dimensions = array<i32: 1>} : vector<1x128xi32>
    %14 = vector.broadcast %12 : i32 to vector<1x128xi32>
    %15 = arith.addi %14, %13 : vector<1x128xi32>
    %16 = vector.broadcast %11 : vector<16x1xi32> to vector<16x128xi32>
    %17 = vector.broadcast %15 : vector<1x128xi32> to vector<16x128xi32>
    %18 = arith.cmpi eq, %16, %17 : vector<16x128xi32>
    %c16_i32_5 = arith.constant 16 : i32
    %19 = vector.broadcast %c16_i32_5 : i32 to vector<1x128xi32>
    %20 = arith.cmpi sge, %15, %19 : vector<1x128xi32>
    %21 = vector.broadcast %20 : vector<1x128xi1> to vector<16x128xi1>
    %22 = arith.ori %18, %21 : vector<16x128xi1>
    %cst_6 = arith.constant -1.000000e+30 : f32
    %23 = vector.broadcast %cst_6 : f32 to vector<16x128xf32>
    %24 = arith.select %22, %23, %7 : vector<16x128xi1>, vector<16x128xf32>
    %c0_7 = arith.constant 0 : index
    %c0_8 = arith.constant 0 : index
    %25 = vector.load %arg7[%c0_7, %c0_8] : memref<16x1xf32, #tpu.memory_space<vmem>>, vector<16x1xf32>
    %cst_9 = arith.constant dense<0xFF800000> : vector<16xf32>
    %26 = vector.multi_reduction <maximumf>, %24, %cst_9 [1] : vector<16x128xf32> to vector<16xf32>
    %27 = vector.shape_cast %26 : vector<16xf32> to vector<16x1xf32>
    %28 = arith.maximumf %25, %27 : vector<16x1xf32>
    %29 = arith.subf %25, %28 : vector<16x1xf32>
    %30 = math.exp %29 : vector<16x1xf32>
    %c0_10 = arith.constant 0 : index
    %c0_11 = arith.constant 0 : index
    %31 = vector.load %arg8[%c0_10, %c0_11] : memref<16x1xf32, #tpu.memory_space<vmem>>, vector<16x1xf32>
    %32 = arith.mulf %30, %31 : vector<16x1xf32>
    %33 = vector.broadcast %28 : vector<16x1xf32> to vector<16x128xf32>
    %34 = arith.subf %24, %33 : vector<16x128xf32>
    %35 = math.exp %34 : vector<16x128xf32>
    %cst_12 = arith.constant dense<0.000000e+00> : vector<16xf32>
    %36 = vector.multi_reduction <add>, %35, %cst_12 [1] : vector<16x128xf32> to vector<16xf32>
    %37 = vector.shape_cast %36 : vector<16xf32> to vector<16x1xf32>
    %38 = arith.addf %32, %37 : vector<16x1xf32>
    %c0_13 = arith.constant 0 : index
    %c0_14 = arith.constant 0 : index
    %39 = vector.load %arg8[%c0_13, %c0_14] : memref<16x1xf32, #tpu.memory_space<vmem>>, vector<16x1xf32>
    tpu.vector_store %arg8[%c0_13, %c0_14], %38 {strides = array<i32>} : memref<16x1xf32, #tpu.memory_space<vmem>>, vector<16x1xf32>,
    %c0_15 = arith.constant 0 : index
    %c0_16 = arith.constant 0 : index
    %40 = vector.load %arg7[%c0_15, %c0_16] : memref<16x1xf32, #tpu.memory_space<vmem>>, vector<16x1xf32>
    tpu.vector_store %arg7[%c0_15, %c0_16], %28 {strides = array<i32>} : memref<16x1xf32, #tpu.memory_space<vmem>>, vector<16x1xf32>,
    %c0_17 = arith.constant 0 : index
    %c0_18 = arith.constant 0 : index
    %41 = vector.load %arg4[%c0_17, %c0_18] : memref<16x1xi32, #tpu.memory_space<vmem>>, vector<16x1xi32>
    %c0_19 = arith.constant 0 : index
    %c0_20 = arith.constant 0 : index
    %42 = vector.load %arg5[%c0_19, %c0_20] : memref<1x128xi32, #tpu.memory_space<vmem>>, vector<1x128xi32>
    %43 = vector.broadcast %41 : vector<16x1xi32> to vector<16x128xi32>
    %44 = vector.broadcast %42 : vector<1x128xi32> to vector<16x128xi32>
    %45 = arith.cmpi eq, %43, %44 : vector<16x128xi32>
    %cst_21 = arith.constant dense<true> : vector<16x128xi1>
    %46 = arith.xori %22, %cst_21 : vector<16x128xi1>
    %47 = arith.andi %45, %46 : vector<16x128xi1>
    %c0_22 = arith.constant 0 : index
    %c0_23 = arith.constant 0 : index
    %48 = vector.load %arg9[%c0_22, %c0_23] : memref<16x1xf32, #tpu.memory_space<vmem>>, vector<16x1xf32>
    %49 = arith.extui %47 : vector<16x128xi1> to vector<16x128xi32>
    %50 = arith.sitofp %49 : vector<16x128xi32> to vector<16x128xf32>
    %cst_24 = arith.constant dense<0.000000e+00> : vector<16xf32>
    %51 = vector.multi_reduction <add>, %50, %cst_24 [1] : vector<16x128xf32> to vector<16xf32>
    %52 = vector.shape_cast %51 : vector<16xf32> to vector<16x1xf32>
    %53 = arith.addf %48, %52 : vector<16x1xf32>
    %c0_25 = arith.constant 0 : index
    %c0_26 = arith.constant 0 : index
    %54 = vector.load %arg9[%c0_25, %c0_26] : memref<16x1xf32, #tpu.memory_space<vmem>>, vector<16x1xf32>
    tpu.vector_store %arg9[%c0_25, %c0_26], %53 {strides = array<i32>} : memref<16x1xf32, #tpu.memory_space<vmem>>, vector<16x1xf32>,
    %c0_27 = arith.constant 0 : index
    %c0_28 = arith.constant 0 : index
    %55 = vector.load %arg10[%c0_27, %c0_28] : memref<16x1xf32, #tpu.memory_space<vmem>>, vector<16x1xf32>
    %cst_29 = arith.constant 0.000000e+00 : f32
    %56 = vector.broadcast %cst_29 : f32 to vector<16x128xf32>
    %57 = arith.select %47, %7, %56 : vector<16x128xi1>, vector<16x128xf32>
    %cst_30 = arith.constant dense<0.000000e+00> : vector<16xf32>
    %58 = vector.multi_reduction <add>, %57, %cst_30 [1] : vector<16x128xf32> to vector<16xf32>
    %59 = vector.shape_cast %58 : vector<16xf32> to vector<16x1xf32>
    %60 = arith.addf %55, %59 : vector<16x1xf32>
    %c0_31 = arith.constant 0 : index
    %c0_32 = arith.constant 0 : index
    %61 = vector.load %arg10[%c0_31, %c0_32] : memref<16x1xf32, #tpu.memory_space<vmem>>, vector<16x1xf32>
    tpu.vector_store %arg10[%c0_31, %c0_32], %60 {strides = array<i32>} : memref<16x1xf32, #tpu.memory_space<vmem>>, vector<16x1xf32>,
    %c0_i32_33 = arith.constant 0 : i32
    %62 = arith.cmpi eq, %arg1, %c0_i32_33 : i32
    %63 = arith.extui %62 : i1 to i32
    %c0_i32_34 = arith.constant 0 : i32
    %64 = arith.cmpi ne, %63, %c0_i32_34 : i32
    scf.if %64 {
      %c0_35 = arith.constant 0 : index
      %c0_36 = arith.constant 0 : index
      %65 = vector.load %arg8[%c0_35, %c0_36] : memref<16x1xf32, #tpu.memory_space<vmem>>, vector<16x1xf32>
      %66 = math.log %65 : vector<16x1xf32>
      %c0_37 = arith.constant 0 : index
      %c0_38 = arith.constant 0 : index
      %67 = vector.load %arg7[%c0_37, %c0_38] : memref<16x1xf32, #tpu.memory_space<vmem>>, vector<16x1xf32>
      %68 = arith.addf %66, %67 : vector<16x1xf32>
      %c0_39 = arith.constant 0 : index
      %c0_40 = arith.constant 0 : index
      %69 = vector.load %arg9[%c0_39, %c0_40] : memref<16x1xf32, #tpu.memory_space<vmem>>, vector<16x1xf32>
      %cst_41 = arith.constant 0.000000e+00 : f32
      %70 = vector.broadcast %cst_41 : f32 to vector<16x1xf32>
      %71 = arith.cmpf ogt, %69, %70 : vector<16x1xf32>
      %c0_42 = arith.constant 0 : index
      %c0_43 = arith.constant 0 : index
      %72 = vector.load %arg10[%c0_42, %c0_43] : memref<16x1xf32, #tpu.memory_space<vmem>>, vector<16x1xf32>
      %73 = arith.divf %72, %69 : vector<16x1xf32>
      %74 = arith.subf %73, %68 : vector<16x1xf32>
      %cst_44 = arith.constant 0.000000e+00 : f32
      %75 = vector.broadcast %cst_44 : f32 to vector<16x1xf32>
      %76 = arith.select %71, %74, %75 : vector<16x1xi1>, vector<16x1xf32>
      %c16_i32_45 = arith.constant 16 : i32
      %77 = arith.muli %arg0, %c16_i32_45 : i32
      %78 = tpu.iota {dimensions = array<i32: 0>} : vector<16x1xi32>
      %79 = vector.broadcast %77 : i32 to vector<16x1xi32>
      %80 = arith.addi %79, %78 : vector<16x1xi32>
      %c16_i32_46 = arith.constant 16 : i32
      %81 = vector.broadcast %c16_i32_46 : i32 to vector<16x1xi32>
      %82 = arith.cmpi slt, %80, %81 : vector<16x1xi32>
      %83 = arith.extui %82 : vector<16x1xi1> to vector<16x1xi32>
      %84 = arith.sitofp %83 : vector<16x1xi32> to vector<16x1xf32>
      %85 = arith.mulf %76, %84 : vector<16x1xf32>
      %86 = vector.shape_cast %85 : vector<16x1xf32> to vector<1x16x1xf32>
      %cst_47 = arith.constant dense<0.000000e+00> : vector<1xf32>
      %87 = vector.multi_reduction <add>, %86, %cst_47 [1, 2] : vector<1x16x1xf32> to vector<1xf32>
      %88 = vector.shape_cast %87 : vector<1xf32> to vector<1x1x1xf32>
      %89 = vector.extract %88[0, 0, 0] : f32 from vector<1x1x1xf32>
      %90 = vector.broadcast %89 : f32 to vector<1x1x128xf32>
      %c0_48 = arith.constant 0 : index
      %c0_49 = arith.constant 0 : index
      %c0_50 = arith.constant 0 : index
      %91 = vector.load %arg6[%c0_48, %c0_49, %c0_50] : memref<1x1x128xf32, #tpu.memory_space<vmem>>, vector<1x1x128xf32>
      tpu.vector_store %arg6[%c0_48, %c0_49, %c0_50], %90 {strides = array<i32>} : memref<1x1x128xf32, #tpu.memory_space<vmem>>, vector<1x1x128xf32>,
    } else {
    }
    return
  }
  func.func @transform_0(%arg0: i32, %arg1: i32) -> (i32, i32) {
    %c0_i32 = arith.constant 0 : i32
    %c0_i32_0 = arith.constant 0 : i32
    return %arg0, %c0_i32 : i32, i32
  }
  func.func @transform_1(%arg0: i32, %arg1: i32) -> (i32, i32) {
    %c0_i32 = arith.constant 0 : i32
    %c0_i32_0 = arith.constant 0 : i32
    return %c0_i32, %arg1 : i32, i32
  }
  func.func @transform_2(%arg0: i32, %arg1: i32) -> (i32, i32) {
    %c0_i32 = arith.constant 0 : i32
    %c0_i32_0 = arith.constant 0 : i32
    return %arg0, %c0_i32 : i32, i32
  }
  func.func @transform_3(%arg0: i32, %arg1: i32) -> (i32, i32) {
    %c0_i32 = arith.constant 0 : i32
    %c0_i32_0 = arith.constant 0 : i32
    return %c0_i32, %arg1 : i32, i32
  }
  func.func @transform_4(%arg0: i32, %arg1: i32) -> (i32, i32, i32) {
    %c0_i32 = arith.constant 0 : i32
    %c0_i32_0 = arith.constant 0 : i32
    %c0_i32_1 = arith.constant 0 : i32
    return %arg0, %c0_i32, %c0_i32_0 : i32, i32, i32
  }
}

</mosaic_0001>

<bundles_post_ra>
// kernel: tpu_custom_call.1
= control target key start
LH: loop header
LB: loop body
LE: loop exit
PB: predicated region body
PF: predicated region fallthrough
CT: control target
= control target key end

     0   :  { %9 = vsyncpa [#allocation7], 0  ;;  %s511_s0 = inlined_call_operand.hbm [shape: bf16[16,32], index: 0, kind: input, shape index: {}]   ;;  %s512_s1 = inlined_call_operand.vmem [shape: bf16[32,128], index: 1, kind: input, shape index: {}]   ;;  %s513_s2 = inlined_call_operand.vmem [shape: s32[16,1], index: 2, kind: input, shape index: {}]   ;;  %s514_s3 = inlined_call_operand.vmem [shape: s32[1,128], index: 3, kind: input, shape index: {}]   ;;  %s515_s4 = inlined_call_operand.hbm [shape: f32[1,1,128], index: 4, kind: output, shape index: {}]  }
   0x1   :  { %10 = vsyncpa [#allocation8], 0  ;;  %s15_s17 = sshll.u32 %s511_s0, 4  ;;  %s391_s18 = smov [#allocation6]   ;;  %s16_s17 = int_to_ptr.hbm [resolvable:$true] %s15_s17 }
   0x2   :  { %s17_s19 = sshll.u32 %s391_s18, 4  ;;  %s392_s20 = smov 64   ;;  %s18_s19 = int_to_ptr.vmem [resolvable:$true] %s17_s19 }
   0x3   :  { %s393_s21 = smov 4  }
   0x4   :  { %23 = dma.hbm_to_vmem [thread:$0]  %s16_s17, 128, %s18_s19, [#allocation7], %s392_s20, %s392_s20, %s393_s21  }
   0x5   :  { %387 = dma.done.wait [#allocation7], 128  }
   0x6   :  { %388 = vsyncadd [#allocation7], 4294967168  ;;  %v394_v0 = vmov 0   ;;  %v308_v1 = vld [vmem:[%s512_s1 + $0x8] sm:$0xff]  ;;  %v157_v2 = vld [vmem:[%s513_s2] sm:$0xff]  ;;  %vm71_vm0 = vcmask 261120   ;;  %v92_v7 = vlaneseq }
   0x7   :  { %320 = vset.pattern.permute.xlu2 %v394_v0  ;;  %319 = vset.pattern.permute.xlu1 %v394_v0  ;;  %v307_v3 = vld [vmem:[%s512_s1] sm:$0xff]  ;;  %v158_v5 = vld [vmem:[%s513_s2 + $0x8] sm:$0xff]  ;;  %vm395_vm5 = vmmov 1   ;;  %vm39_vm8 = vcmask 7168   ;;  %v396_v15 = vmov -1e+30  }
   0x8   :  { %321 = vset.pattern.permute.xlu0 %v394_v0  ;;  %81 = vmatpush.bf16.msra.mxu0 %v308_v1  ;;  %v306_v4 = vld [vmem:[#allocation6] sm:$0xff]  ;;  %v93_v8 = vshrl.u32 %v92_v7, 7  ;;  %v100_v9 = vand.u32 127, %v92_v7  ;;  %40 = vst.msk [vmem:[#allocation2] sm:$0xff] %vm39_vm8, %v396_v15  ;;  %v397_v22 = vmov 0.0   ;;  %s398_s1 = smov [#allocation9]  }
   0x9   :  { %161 = vperm.xlu2 %320, %v157_v2   ;;  %v322_v11 = vld [vmem:[%s514_s3] ss:$0 sm:$0xff]  ;;  %41 = vst.msk [vmem:[#allocation2 + $0x8] sm:$0xff] %vm39_vm8, %v396_v15  ;;  %s279_s2 = sshll.u32 %s398_s1, 4  ;;  %s281_s6 = sshll.u32 %s515_s4, 4  ;;  %s280_s2 = int_to_ptr.vmem [resolvable:$true] %s279_s2  ;;  %s282_s6 = int_to_ptr.hbm [resolvable:$true] %s281_s6 }
   0xa   :  { %v94_v12 = vadd.s32 8, %v93_v8  ;;  %vm105_vm1 = vcmp.ge.s32.totalorder %v100_v9, 16  ;;  %vm103_vm9 = vcmp.eq.s32.totalorder %v93_v8, %v100_v9  ;;  %42 = vst.msk [vmem:[#allocation3] sm:$0xff] %vm39_vm8, %v397_v22 }
   0xb   :  { %vm108_vm10 = vmor %vm103_vm9, %vm105_vm1  ;;  %43 = vst.msk [vmem:[#allocation3 + $0x8] sm:$0xff] %vm39_vm8, %v397_v22 }
   0xc   :  { %82 = vmatpush.bf16.msra.mxu0 %v307_v3  ;;  %vm104_vm3 = vcmp.eq.s32.totalorder %v94_v12, %v100_v9  ;;  %44 = vst.msk [vmem:[#allocation4] sm:$0xff] %vm39_vm8, %v397_v22  ;;  %vm169_vm12 = vmxor %vm108_vm10, %vm395_vm5 }
   0xd   :  { %vm442_vm4 = vmor %vm104_vm3, %vm105_vm1  ;;  %45 = vst.msk [vmem:[#allocation4 + $0x8] sm:$0xff] %vm39_vm8, %v397_v22 }
   0xe   :  { %vm170_vm6 = vmxor %vm442_vm4, %vm395_vm5  ;;  %46 = vst.msk [vmem:[#allocation5] sm:$0xff] %vm39_vm8, %v397_v22 }
   0xf   :  { %303 = vmatmul.msk.bf16.vlgmr.msra.gmra.mxu0 %vm71_vm0, %v306_v4  ;;  %47 = vst.msk [vmem:[#allocation5 + $0x8] sm:$0xff] %vm39_vm8, %v397_v22  ;;  %v112_v25 = vld [vmem:[#allocation2] sm:$0xff] }
  0x10   :  { %v113_v29 = vld [vmem:[#allocation2 + $0x8] sm:$0xff] }
  0x11   :  { %164 = vperm.xlu2 %320, %v158_v5   ;;  %v126_v53 = vld [vmem:[#allocation3] sm:$0xff] }
  0x12   :  { %v127_v60 = vld [vmem:[#allocation3 + $0x8] sm:$0xff] }
  0x13   :  { %v173_v38 = vld [vmem:[#allocation4] sm:$0xff] }
  0x14   :  { %v174_v47 = vld [vmem:[#allocation4 + $0x8] sm:$0xff] }
  0x15   :  { %v187_v4 = vld [vmem:[#allocation5] sm:$0xff] }
  0x16   :  { %v188_v15 = vld [vmem:[#allocation5 + $0x8] sm:$0xff] }
  0x63   :  { %v162_v6 = vpop.permute.xlu2 %161 }
  0x64   :  { %vm167_vm11 = vcmp.eq.s32.totalorder %v162_v6, %v322_v11 }
  0x65   :  { %vm464_vm13 = vmand %vm167_vm11, %vm169_vm12 }
  0x66   :  { %v304_v24 = vsel %vm464_vm13, 1.0, %v397_v22 }
  0x6b   :  { %v165_v10 = vpop.permute.xlu2 %164 }
  0x6c   :  { %vm168_vm2 = vcmp.eq.s32.totalorder %v165_v10, %v322_v11 }
  0x6d   :  { %vm449_vm7 = vmand %vm168_vm2, %vm170_vm6 }
  0x6e   :  { %v305_v33 = vsel %vm449_vm7, 1.0, %v397_v22 }
  0x8c   :  { %v84_v16 = vpop.f32.mrf.mxu0 }
  0x8d   :  { %v89_v17 = vmul.f32 14.285714, %v84_v16 }
  0x8f   :  { %v110_v18 = vsel %vm108_vm10, -1e+30, %v89_v17  ;;  %v189_v45 = vsel %vm464_vm13, %v89_v17, 0.0 }
  0x90   :  { %114 = vmax.xlane.f32.xlu0 %v110_v18 }
  0x94   :  { %v86_v19 = vpop.f32.mrf.mxu0 }
  0x95   :  { %v90_v20 = vmul.f32 14.285714, %v86_v19 }
  0x97   :  { %v111_v21 = vsel %vm442_vm4, -1e+30, %v90_v20  ;;  %v190_v46 = vsel %vm449_vm7, %v90_v20, 0.0 }
  0x98   :  { %116 = vmax.xlane.f32.xlu0 %v111_v21 }
  0xa0   :  { %179 = vadd.xlane.f32.xlu0 %v304_v24 }
 0x103   :  { %v115_v26 = vpop.xlane.xlu0 %114 }
 0x104   :  { %v118_v27 = vmax.f32 %v112_v25, %v115_v26 }
 0x106   :  { %v120_v28 = vsub.f32 %v112_v25, %v118_v27  ;;  %155 = vst.msk [vmem:[#allocation2] sm:$0xff] %vm39_vm8, %v118_v27  ;;  %132 = vperm.xlu1 %319, %v118_v27  }
 0x108   :  { %v122_v50 = vmul.f32 1.442695, %v120_v28 }
 0x10b   :  { %v117_v30 = vpop.xlane.xlu0 %116 }
 0x10c   :  { %v119_v31 = vmax.f32 %v113_v29, %v117_v30 }
 0x10e   :  { %v121_v32 = vsub.f32 %v113_v29, %v119_v31  ;;  %156 = vst.msk [vmem:[#allocation2 + $0x8] sm:$0xff] %vm39_vm8, %v119_v31  ;;  %137 = vperm.xlu1 %319, %v119_v31   ;;  %v208_v31 = vld [vmem:[#allocation2] sm:$0xff] }
 0x110   :  { %v124_v51 = vmul.f32 1.442695, %v121_v32 }
 0x113   :  { %v180_v37 = vpop.xlane.xlu0 %179 }
 0x114   :  { %v183_v39 = vadd.f32 %v180_v37, %v173_v38 }
 0x115   :  { %v209_v37 = vld [vmem:[#allocation2 + $0x8] sm:$0xff] }
 0x116   :  { %185 = vst.msk [vmem:[#allocation4] sm:$0xff] %vm39_vm8, %v183_v39 }
 0x11d   :  { %v480_v54 = vld [vmem:[#allocation4] sm:$0xff] }
 0x11e   :  { %vm223_vm14 = vweird.f32 %v480_v54  ;;  %v229_v12 = vand.u32 2147483648, %v480_v54  ;;  %v227_v14 = vand.u32 2147483647, %v480_v54  ;;  %vm214_vm6 = vcmp.gt.f32.partialorder %v480_v54, 0.0 }
 0x120   :  { %v230_v20 = vor.u32 1.1754944e-38, %v229_v12  ;;  %vm228_vm2 = vcmp.eq.f32.partialorder %v227_v14, 8.507059e+37 }
 0x138   :  { %181 = vadd.xlane.f32.xlu1 %v305_v33 }
 0x178   :  { %v133_v34 = vpop.permute.xlu1 %132 }
 0x179   :  { %v140_v35 = vsub.f32 %v110_v18, %v133_v34 }
 0x17b   :  { %v142_v36 = vmul.f32 1.442695, %v140_v35 }
 0x17d   :  { %323 = vpow2.f32 %v142_v36 }
 0x180   :  { %v138_v40 = vpop.permute.xlu1 %137 }
 0x181   :  { %v141_v41 = vsub.f32 %v111_v21, %v138_v40 }
 0x183   :  { %v324_v42 = vpop.eup %323  ;;  %v144_v43 = vmul.f32 1.442695, %v141_v41 }
 0x184   :  { %146 = vadd.xlane.f32.xlu2 %v324_v42 }
 0x185   :  { %325 = vpow2.f32 %v144_v43 }
 0x186   :  { %327 = vpow2.f32 %v122_v50 }
 0x187   :  { %329 = vpow2.f32 %v124_v51 }
 0x188   :  { %331 = vrcp.f32 %v480_v54 }
 0x18b   :  { %v326_v44 = vpop.eup %325 }
 0x18c   :  { %148 = vadd.xlane.f32.xlu0 %v326_v44  ;;  %v328_v52 = vpop.eup %327 }
 0x18d   :  { %v128_v55 = vmul.f32 %v328_v52, %v126_v53  ;;  %v330_v59 = vpop.eup %329 }
 0x18e   :  { %v332_v61 = vpop.eup %331  ;;  %v129_v62 = vmul.f32 %v330_v59, %v127_v60 }
 0x18f   :  { %v219_v1 = vmul.f32 %v332_v61, %v480_v54  ;;  %vm224_vm15 = vweird.f32 %v332_v61 }
 0x190   :  { %vm494_vm0 = vmor %vm223_vm14, %vm224_vm15 }
 0x191   :  { %v220_v3 = vsub.f32 1.0, %v219_v1 }
 0x193   :  { %v221_v9 = vmul.f32 %v332_v61, %v220_v3 }
 0x194   :  { %191 = vadd.xlane.f32.xlu0 %v189_v45 }
 0x195   :  { %v222_v13 = vadd.f32 %v332_v61, %v221_v9 }
 0x197   :  { %v226_v22 = vsel %vm494_vm0, %v332_v61, %v222_v13 }
 0x198   :  { %v231_v29 = vsel %vm228_vm2, %v230_v20, %v226_v22 }
 0x19c   :  { %193 = vadd.xlane.f32.xlu0 %v190_v46 }
 0x1ab   :  { %v182_v48 = vpop.xlane.xlu1 %181 }
 0x1ac   :  { %v184_v49 = vadd.f32 %v182_v48, %v174_v47 }
 0x1ae   :  { %186 = vst.msk [vmem:[#allocation4 + $0x8] sm:$0xff] %vm39_vm8, %v184_v49 }
 0x1b5   :  { %v484_v58 = vld [vmem:[#allocation4 + $0x8] sm:$0xff] }
 0x1b6   :  { %333 = vrcp.f32 %v484_v58  ;;  %vm238_vm1 = vweird.f32 %v484_v58  ;;  %v244_v24 = vand.u32 2147483648, %v484_v58  ;;  %v242_v27 = vand.u32 2147483647, %v484_v58 }
 0x1b7   :  { %vm215_vm7 = vcmp.gt.f32.partialorder %v484_v58, 0.0 }
 0x1b8   :  { %v245_v32 = vor.u32 1.1754944e-38, %v244_v24  ;;  %vm243_vm5 = vcmp.eq.f32.partialorder %v242_v27, 8.507059e+37 }
 0x1bc   :  { %v334_v2 = vpop.eup %333 }
 0x1bd   :  { %v234_v6 = vmul.f32 %v334_v2, %v484_v58  ;;  %vm239_vm3 = vweird.f32 %v334_v2 }
 0x1be   :  { %vm240_vm4 = vmor %vm238_vm1, %vm239_vm3 }
 0x1bf   :  { %v235_v11 = vsub.f32 1.0, %v234_v6 }
 0x1c1   :  { %v236_v17 = vmul.f32 %v334_v2, %v235_v11 }
 0x1c3   :  { %v237_v26 = vadd.f32 %v334_v2, %v236_v17 }
 0x1c5   :  { %v241_v35 = vsel %vm240_vm4, %v334_v2, %v237_v26 }
 0x1c6   :  { %v246_v39 = vsel %vm243_vm5, %v245_v32, %v241_v35 }
 0x1f7   :  { %v147_v56 = vpop.xlane.xlu2 %146 }
 0x1f8   :  { %v150_v57 = vadd.f32 %v147_v56, %v128_v55 }
 0x1fa   :  { %153 = vst.msk [vmem:[#allocation3] sm:$0xff] %vm39_vm8, %v150_v57 }
 0x1ff   :  { %v149_v63 = vpop.xlane.xlu0 %148 }
 0x200   :  { %v151_v0 = vadd.f32 %v149_v63, %v129_v62 }
 0x201   :  { %v202_v5 = vld [vmem:[#allocation3] sm:$0xff] }
 0x202   :  { %154 = vst.msk [vmem:[#allocation3 + $0x8] sm:$0xff] %vm39_vm8, %v151_v0  ;;  %335 = vlog2.f32 %v202_v5 }
 0x207   :  { %v192_v7 = vpop.xlane.xlu0 %191 }
 0x208   :  { %v195_v8 = vadd.f32 %v192_v7, %v187_v4  ;;  %v336_v18 = vpop.eup %335 }
 0x209   :  { %v203_v10 = vld [vmem:[#allocation3 + $0x8] sm:$0xff]  ;;  %v205_v25 = vmul.f32 0.6931472, %v336_v18 }
 0x20a   :  { %197 = vst.msk [vmem:[#allocation5] sm:$0xff] %vm39_vm8, %v195_v8  ;;  %337 = vlog2.f32 %v203_v10 }
 0x20b   :  { %v210_v34 = vadd.f32 %v208_v31, %v205_v25 }
 0x20f   :  { %v194_v19 = vpop.xlane.xlu0 %193 }
 0x210   :  { %v196_v21 = vadd.f32 %v194_v19, %v188_v15  ;;  %v338_v28 = vpop.eup %337 }
 0x211   :  { %v216_v23 = vld [vmem:[#allocation5] sm:$0xff]  ;;  %v207_v33 = vmul.f32 0.6931472, %v338_v28 }
 0x212   :  { %198 = vst.msk [vmem:[#allocation5 + $0x8] sm:$0xff] %vm39_vm8, %v196_v21  ;;  %v232_v30 = vmul.f32 %v231_v29, %v216_v23 }
 0x213   :  { %v211_v40 = vadd.f32 %v209_v37, %v207_v33 }
 0x214   :  { %v248_v36 = vsub.f32 %v232_v30, %v210_v34 }
 0x216   :  { %v250_v43 = vsel %vm214_vm6, %v248_v36, 0.0 }
 0x217   :  { %v260_v45 = vsel %vm39_vm8, %v250_v43, 0.0 }
 0x219   :  { %v217_v38 = vld [vmem:[#allocation5 + $0x8] sm:$0xff] }
 0x21a   :  { %v247_v41 = vmul.f32 %v246_v39, %v217_v38 }
 0x21c   :  { %v249_v42 = vsub.f32 %v247_v41, %v211_v40 }
 0x21e   :  { %v251_v44 = vsel %vm215_vm7, %v249_v42, 0.0 }
 0x21f   :  { %v261_v46 = vsel %vm39_vm8, %v251_v44, 0.0 }
 0x220   :  { %v262_v47 = vadd.f32 %v261_v46, %v260_v45 }
 0x222   :  { %263 = vadd.xlane.f32.xlu0 %v262_v47 }
 0x295   :  { %v264_v48 = vpop.xlane.xlu0 %263 }
 0x296   :  { %v265_v49 = vrot.slane %v264_v48, 4 }
 0x298   :  { %v266_v50 = vadd.f32 %v265_v49, %v264_v48 }
 0x29a   :  { %v267_v51 = vrot.slane %v266_v50, 2 }
 0x29c   :  { %v268_v52 = vadd.f32 %v267_v51, %v266_v50 }
 0x29e   :  { %v269_v53 = vrot.slane %v268_v52, 1 }
 0x2a0   :  { %v270_v55 = vadd.f32 %v269_v53, %v268_v52 }
 0x2a2   :  { %309 = vpush %v270_v55 }
 0x2d3   :  { %s310_s7 = spop %309 }
 0x2d4   :  { %v272_v54 = vstv %s310_s7 }
 0x2d5   :  { %273 = vst [vmem:[#allocation9] sm:$0x1] %v272_v54 }
 0x2d6   :  { %284 = dma.vmem_to_hbm [thread:$0]  %s280_s2, 16, %s282_s6, [#allocation8]  }
 0x2d7   :  { %389 = dma.done.wait [#allocation8], 16  }
 0x2d8   :  { %390 = vsyncadd [#allocation8], 4294967280 }
 0x2d9   :  { %289 = vsyncpa [#allocation7], 1 }
 0x2da   :  { %290 = vsyncpa [#allocation8], 1 }

</bundles_post_ra>
